<compile_context>
chip_gen: v5e
topology: v5e:2x2
jax: 0.10.0
libtpu: 0.0.40
codegen_flags: <defaults>
</compile_context>

<pallas_src>
import jax
import jax.numpy as jnp
from jax.experimental import pallas as pl
from jax.experimental.pallas import tpu as pltpu


LANES = 128
TARGET_BLOCK_BYTES = 4 << 20       # ~4 MiB per input per grid step
MAX_F32_BLOCK_BYTES = 8 << 20      # cap on the in-kernel f32 working tile


def _round_up(x, m):
    return ((x + m - 1) // m) * m


def _num_tensorcores():
    """Best-effort TensorCore count. The 2-way reduction split only helps on
    2-TC chips (v7x); on single-TC v5e/v6e it is pure overhead, so default 1."""
    try:
        info = pltpu.get_tpu_info()
    except Exception:
        return 1
    for attr in ("num_cores", "core_count", "num_tensorcores",
                 "tensor_cores_per_chip", "cores_per_chip"):
        v = getattr(info, attr, None)
        if isinstance(v, int) and 1 <= v <= 8:
            return v
    return 1


def _to_lanes_2d(arr):
    """Flatten to (rows, 128). Copy-free when numel % 128 == 0."""
    flat = arr.reshape(-1)
    rem = flat.shape[0] % LANES
    if rem != 0:
        # Rare ragged-tail fallback (conv feature maps almost always have
        # numel % 128 == 0). Zero padding on both operands contributes 0 to
        # the squared-error sum.
        flat = jnp.pad(flat, (0, LANES - rem))
    return flat.reshape(-1, LANES)


def _make_mse_sum_kernel(tile_rows, tiles_per_split, valid_rows, needs_row_mask):
    """Build the squared-error-sum kernel (all tiling params are static)."""

    def kernel(x_ref, t_ref, out_ref, acc_ref):
        i = pl.program_id(1)

        @pl.when(i == 0)
        def _():
            acc_ref[...] = jnp.zeros_like(acc_ref)

        d = x_ref[...].astype(jnp.float32) - t_ref[...].astype(jnp.float32)
        sq = d * d

        if needs_row_mask:
            # Only the tile(s) that overhang the end of the real array take
            # the masked path; full tiles accumulate without iota/compare.
            c = pl.program_id(0)
            tile = c * tiles_per_split + i
            is_full = (tile + 1) * tile_rows <= valid_rows

            @pl.when(is_full)
            def _():
                acc_ref[...] += jnp.sum(sq.reshape(-1, 8, LANES), axis=0)

            @pl.when(jnp.logical_not(is_full))
            def _():
                row = tile * tile_rows + jax.lax.broadcasted_iota(
                    jnp.int32, (tile_rows, LANES), 0)
                # Keep the select (not a multiply): padded/garbage rows must
                # not propagate NaN/Inf into the accumulator.
                masked = jnp.where(row < valid_rows, sq, 0.0)
                acc_ref[...] += jnp.sum(masked.reshape(-1, 8, LANES), axis=0)
        else:
            # Fold the tile into an (8, 128) accumulator with pure VPU adds;
            # the cross-lane (XLU) reduce happens once, on the last step.
            acc_ref[...] += jnp.sum(sq.reshape(-1, 8, LANES), axis=0)

        @pl.when(i == pl.num_programs(1) - 1)
        def _():
            out_ref[0, 0] = jnp.sum(acc_ref[...])

    return kernel


def _squared_error_sum(x2d, t2d):
    """Sum of squared differences of two (rows, 128) arrays (f32 accumulate)."""
    assert x2d.shape == t2d.shape
    rows = x2d.shape[0]
    x_isz = jnp.dtype(x2d.dtype).itemsize
    t_isz = jnp.dtype(t2d.dtype).itemsize

    # Sublane alignment: 8 rows for 4-byte dtypes, 16 for 2-byte, 32 for 1-byte.
    align = 8 * max(1, 4 // min(x_isz, t_isz))

    # Byte-budgeted row tile: ~4 MiB per input block, also capping the f32
    # in-kernel working tile so the double-buffered footprint stays well
    # under v7x's 64 MiB physical VMEM.
    budget_rows = min(TARGET_BLOCK_BYTES // (LANES * max(x_isz, t_isz)),
                      MAX_F32_BLOCK_BYTES // (LANES * 4))
    budget_rows = max(align, (budget_rows // align) * align)
    tile_rows = min(budget_rows, _round_up(rows, align))

    total_tiles = pl.cdiv(rows, tile_rows)
    nsplit = max(1, min(_num_tensorcores(), total_tiles))
    tiles_per_split = pl.cdiv(total_tiles, nsplit)
    padded_tiles = nsplit * tiles_per_split
    needs_clamp = padded_tiles > total_tiles
    needs_row_mask = padded_tiles * tile_rows > rows

    def in_map(c, i):
        t = c * tiles_per_split + i
        if needs_clamp:
            # Keep the block index in range; duplicated reads are fully
            # masked out in the kernel.
            t = jnp.minimum(t, total_tiles - 1)
        return (t, 0)

    kernel = _make_mse_sum_kernel(tile_rows, tiles_per_split, rows,
                                  needs_row_mask)

    # Explicit scoped-VMEM budget: 2x double-buffered input blocks + headroom
    # for the in-kernel f32 intermediates + accumulator.
    x_block = tile_rows * LANES * x_isz
    t_block = tile_rows * LANES * t_isz
    f32_block = tile_rows * LANES * 4
    vmem_limit = 2 * (x_block + t_block) + 3 * f32_block + (2 << 20)
    vmem_limit = int(max(vmem_limit, 16 << 20))

    n_elems = x2d.size
    cost = pl.CostEstimate(
        flops=3 * n_elems,
        transcendentals=0,
        bytes_accessed=n_elems * x_isz + n_elems * t_isz + 4 * nsplit)

    # NOTE: on v7x, if the leading "parallel" axis is not actually sharded
    # across the two TensorCores, switching it to pltpu.CORE_PARALLEL (or
    # pl.core_map) would nearly double effective HBM bandwidth here.
    partial_sums = pl.pallas_call(
        kernel,
        out_shape=jax.ShapeDtypeStruct((nsplit, 1), jnp.float32),
        grid_spec=pltpu.PrefetchScalarGridSpec(
            num_scalar_prefetch=0,
            grid=(nsplit, tiles_per_split),
            in_specs=[
                pl.BlockSpec((tile_rows, LANES), in_map),
                pl.BlockSpec((tile_rows, LANES), in_map),
            ],
            out_specs=pl.BlockSpec(
                (1, 1), lambda c, i: (c, 0),
                memory_space=pltpu.MemorySpace.SMEM),
            scratch_shapes=[pltpu.VMEM((8, LANES), jnp.float32)],
        ),
        compiler_params=pltpu.CompilerParams(
            dimension_semantics=("parallel", "arbitrary"),
            vmem_limit_bytes=vmem_limit),
        cost_estimate=cost,
    )(x2d, t2d)

    return jnp.sum(partial_sums)


@jax.jit
def _content_loss_prepared(data, t2d):
    """MSE(data, target) where the target is already in (rows, 128) layout.
    No wrapper-side dtype cast: both operands are upcast to f32 in-kernel."""
    n = data.size
    x2d = _to_lanes_2d(data)
    assert x2d.shape == t2d.shape, "data/target element-count mismatch"
    s = _squared_error_sum(x2d, t2d)
    out_dt = jnp.result_type(data.dtype, t2d.dtype)
    if not jnp.issubdtype(out_dt, jnp.floating):
        out_dt = jnp.float32
    return (s / jnp.float32(n)).astype(out_dt)


def content_loss(data, target):
    """Pallas equivalent of F.mse_loss(data, target) (mean reduction)."""
    target = jnp.asarray(target)
    assert data.shape == target.shape, "data/target shape mismatch"
    return _content_loss_prepared(data, _to_lanes_2d(target))


class ContentLoss:
    """Mirror of the PyTorch module: holds a fixed target feature."""

    def __init__(self, target_feature):
        t = jnp.asarray(target_feature)      # clone().detach() equivalent
        self._shape = t.shape
        # Prepare the lane-dense target layout once (no per-call cast/pad).
        self._t2d = _to_lanes_2d(t)

    def __call__(self, data):
        assert data.shape == self._shape, "data/target shape mismatch"
        return _content_loss_prepared(data, self._t2d)


if __name__ == "__main__":
    key = jax.random.PRNGKey(0)
    k1, k2 = jax.random.split(key)

    # NCHW feature maps, small shapes
    shape = (2, 4, 16, 16)
    target_feature = jax.random.normal(k1, shape, dtype=jnp.float32)
    data = jax.random.normal(k2, shape, dtype=jnp.float32)

    module = ContentLoss(target_feature)
    loss = jax.block_until_ready(module(data))

    # sanity check against plain-JAX reference
    ref = jnp.mean((data - target_feature) ** 2)
    assert jnp.allclose(loss, ref, rtol=1e-5, atol=1e-6), (loss, ref)

    print("KERNEL_OK")
</pallas_src>

<mosaic_0001>
module attributes {stable_mosaic.version = 11 : i64} {
  func.func @kernel(%arg0: i32, %arg1: i32, %arg2: memref<16x128xf32, #tpu.memory_space<vmem>>, %arg3: memref<16x128xf32, #tpu.memory_space<vmem>>, %arg4: memref<1x1xf32, #tpu.memory_space<smem>>, %arg5: memref<8x128xf32, #tpu.memory_space<vmem>>) attributes {dimension_semantics = [#tpu.dimension_semantics<parallel>, #tpu.dimension_semantics<arbitrary>], iteration_bounds = array<i64: 1, 1>, scalar_prefetch = 0 : i64, scratch_operands = 1 : i64, tpu.core_type = #tpu.core_type<tc>, window_params = [{transform_indices = @transform_0, window_bounds = array<i64: 16, 128>}, {transform_indices = @transform_1, window_bounds = array<i64: 16, 128>}, {transform_indices = @transform_2, window_bounds = array<i64: 1, 1>}]} {
    %c0_i32 = arith.constant 0 : i32
    %0 = arith.cmpi eq, %arg1, %c0_i32 : i32
    %1 = arith.extui %0 : i1 to i32
    %c0_i32_0 = arith.constant 0 : i32
    %2 = arith.cmpi ne, %1, %c0_i32_0 : i32
    scf.if %2 {
      %cst_10 = arith.constant 0.000000e+00 : f32
      %15 = vector.broadcast %cst_10 : f32 to vector<8x128xf32>
      %c0_11 = arith.constant 0 : index
      %c0_12 = arith.constant 0 : index
      %16 = vector.load %arg5[%c0_11, %c0_12] : memref<8x128xf32, #tpu.memory_space<vmem>>, vector<8x128xf32>
      tpu.vector_store %arg5[%c0_11, %c0_12], %15 {strides = array<i32>} : memref<8x128xf32, #tpu.memory_space<vmem>>, vector<8x128xf32>,
    } else {
    }
    %c0 = arith.constant 0 : index
    %c0_1 = arith.constant 0 : index
    %3 = vector.load %arg2[%c0, %c0_1] : memref<16x128xf32, #tpu.memory_space<vmem>>, vector<16x128xf32>
    %c0_2 = arith.constant 0 : index
    %c0_3 = arith.constant 0 : index
    %4 = vector.load %arg3[%c0_2, %c0_3] : memref<16x128xf32, #tpu.memory_space<vmem>>, vector<16x128xf32>
    %5 = arith.subf %3, %4 : vector<16x128xf32>
    %6 = arith.mulf %5, %5 : vector<16x128xf32>
    %c0_4 = arith.constant 0 : index
    %c0_5 = arith.constant 0 : index
    %7 = vector.load %arg5[%c0_4, %c0_5] : memref<8x128xf32, #tpu.memory_space<vmem>>, vector<8x128xf32>
    %8 = vector.shape_cast %6 : vector<16x128xf32> to vector<2x8x128xf32>
    %cst = arith.constant dense<0.000000e+00> : vector<8x128xf32>
    %9 = vector.multi_reduction <add>, %8, %cst [0] : vector<2x8x128xf32> to vector<8x128xf32>
    %10 = arith.addf %7, %9 : vector<8x128xf32>
    %c0_6 = arith.constant 0 : index
    %c0_7 = arith.constant 0 : index
    %11 = vector.load %arg5[%c0_6, %c0_7] : memref<8x128xf32, #tpu.memory_space<vmem>>, vector<8x128xf32>
    tpu.vector_store %arg5[%c0_6, %c0_7], %10 {strides = array<i32>} : memref<8x128xf32, #tpu.memory_space<vmem>>, vector<8x128xf32>,
    %c0_i32_8 = arith.constant 0 : i32
    %12 = arith.cmpi eq, %arg1, %c0_i32_8 : i32
    %13 = arith.extui %12 : i1 to i32
    %c0_i32_9 = arith.constant 0 : i32
    %14 = arith.cmpi ne, %13, %c0_i32_9 : i32
    scf.if %14 {
      %c0_10 = arith.constant 0 : index
      %c0_11 = arith.constant 0 : index
      %15 = vector.load %arg5[%c0_10, %c0_11] : memref<8x128xf32, #tpu.memory_space<vmem>>, vector<8x128xf32>
      %16 = vector.shape_cast %15 : vector<8x128xf32> to vector<1x8x128xf32>
      %cst_12 = arith.constant dense<0.000000e+00> : vector<1xf32>
      %17 = vector.multi_reduction <add>, %16, %cst_12 [1, 2] : vector<1x8x128xf32> to vector<1xf32>
      %18 = vector.shape_cast %17 : vector<1xf32> to vector<1x1x1xf32>
      %19 = vector.extract %18[0, 0, 0] : f32 from vector<1x1x1xf32>
      %c0_13 = arith.constant 0 : index
      %c0_14 = arith.constant 0 : index
      %20 = memref.load %arg4[%c0_13, %c0_14] : memref<1x1xf32, #tpu.memory_space<smem>>
      memref.store %19, %arg4[%c0_13, %c0_14] : memref<1x1xf32, #tpu.memory_space<smem>>
    } else {
    }
    return
  }
  func.func @transform_0(%arg0: i32, %arg1: i32) -> (i32, i32) {
    %c1_i32 = arith.constant 1 : i32
    %0 = arith.muli %arg0, %c1_i32 : i32
    %1 = arith.addi %0, %arg1 : i32
    %c0_i32 = arith.constant 0 : i32
    %c0_i32_0 = arith.constant 0 : i32
    return %1, %c0_i32 : i32, i32
  }
  func.func @transform_1(%arg0: i32, %arg1: i32) -> (i32, i32) {
    %c1_i32 = arith.constant 1 : i32
    %0 = arith.muli %arg0, %c1_i32 : i32
    %1 = arith.addi %0, %arg1 : i32
    %c0_i32 = arith.constant 0 : i32
    %c0_i32_0 = arith.constant 0 : i32
    return %1, %c0_i32 : i32, i32
  }
  func.func @transform_2(%arg0: i32, %arg1: i32) -> (i32, i32) {
    %c0_i32 = arith.constant 0 : i32
    %c0_i32_0 = arith.constant 0 : i32
    return %arg0, %c0_i32 : i32, i32
  }
}

</mosaic_0001>

<bundles_post_ra>
// kernel: _content_loss_prepared.1
= control target key start
LH: loop header
LB: loop body
LE: loop exit
PB: predicated region body
PF: predicated region fallthrough
CT: control target
= control target key end

     0   :  { %s163_s0 = inlined_call_operand.vmem [shape: f32[16,128], index: 0, kind: input, shape index: {}]   ;;  %s164_s1 = inlined_call_operand.vmem [shape: f32[16,128], index: 1, kind: input, shape index: {}]   ;;  %s165_s2 = inlined_call_operand.hbm [shape: f32[1,1], index: 2, kind: output, shape index: {}]  }
   0x1   :  { %v61_v0 = vld [vmem:[%s163_s0] sm:$0xff]  ;;  %v62_v1 = vld [vmem:[%s163_s0 + $0x8] sm:$0xff] }
   0x2   :  { %v63_v2 = vld [vmem:[%s164_s1] sm:$0xff]  ;;  %v64_v3 = vld [vmem:[%s164_s1 + $0x8] sm:$0xff] }
   0x3   :  { %v65_v4 = vsub.f32 %v61_v0, %v63_v2 }
   0x4   :  { %7 = vsyncpa [#allocation4], 0  ;;  %v66_v5 = vsub.f32 %v62_v1, %v64_v3  ;;  %s93_s18 = sshll.u32 %s165_s2, 4  ;;  %s132_s19 = smov [#allocation3]   ;;  %s94_s18 = int_to_ptr.hbm [resolvable:$true] %s93_s18 }
   0x5   :  { %v67_v6 = vmul.f32 %v65_v4, %v65_v4 }
   0x6   :  { %v68_v7 = vmul.f32 %v66_v5, %v66_v5 }
   0x8   :  { %v70_v8 = vadd.f32 %v68_v7, %v67_v6 }
   0xa   :  { %77 = vadd.xlane.f32.xlu0 %v70_v8 }
  0x7d   :  { %v78_v9 = vpop.xlane.xlu0 %77 }
  0x7e   :  { %v79_v10 = vrot.slane %v78_v9, 4 }
  0x80   :  { %v80_v11 = vadd.f32 %v79_v10, %v78_v9 }
  0x82   :  { %v81_v12 = vrot.slane %v80_v11, 2 }
  0x84   :  { %v82_v13 = vadd.f32 %v81_v12, %v80_v11 }
  0x86   :  { %v83_v14 = vrot.slane %v82_v13, 1 }
  0x88   :  { %v84_v15 = vadd.f32 %v83_v14, %v82_v13 }
  0x8a   :  { %115 = vpush %v84_v15 }
  0xbb   :  { %s116_s1 = spop %115 }
  0xbc   :  { %87 = sst [smem:[#allocation3]] %s116_s1 }
  0xbd   :  { %96 = dma.smem_to_hbm %s132_s19, 16, %s94_s18, [#allocation4]  }
  0xbe   :  { %130 = dma.done.wait [#allocation4], 16  }
  0xbf   :  { %131 = vsyncadd [#allocation4], 4294967280 }
  0xc0   :  { %101 = sfence }
  0xc1   :  { %102 = vsyncpa [#allocation4], 1 }

</bundles_post_ra>
